<compile_context>
chip_gen: v7x
topology: tpu7x:2x2x1
jax: 0.10.0
libtpu: 0.0.40
codegen_flags: <defaults>
</compile_context>

<pallas_src>
import functools
import math

import jax
import jax.numpy as jnp
from jax import lax
from jax.experimental import pallas as pl
from jax.experimental.pallas import tpu as pltpu

# ---------------- config (small shapes consistent with the module) -------------
BATCH = 1            # Attention's cache is batch-1; the module only supports bsz==1
SEQ = 8
DIM = 64
N_HEADS = 4
HEAD_DIM = DIM // N_HEADS
HALF = HEAD_DIM // 2
HIDDEN = DIM         # FeedForward(hidden_dim=args.dim, multiple_of=1) -> hidden == dim
EPS = 1e-5
ROPE_THETA = 500000.0


# ------------------------------- fused kernel -----------------------------------
def _block_kernel(x_ref, anw_ref, wqkv_ref, wo_ref, fnw_ref, w13_ref, w2_ref,
                  cossin_ref, o_ref, *, n_heads, head_dim, hidden, eps):
    half = head_dim // 2
    x = x_ref[...].astype(jnp.float32)
    S, D = x.shape

    # ---- attention RMSNorm (f32 throughout) ----
    ms = jnp.mean(x * x, axis=-1, keepdims=True)
    xn = (x * lax.rsqrt(ms + eps)) * anw_ref[...]

    # ---- fused QKV projection: one (S,D) x (D,3D) bf16 matmul, f32 accumulate ----
    qkv = jnp.dot(xn.astype(jnp.bfloat16), wqkv_ref[...],
                  preferred_element_type=jnp.float32)
    q = qkv[:, 0 * D:1 * D]      # per-head [real|imag] column layout, pre-scaled
    k = qkv[:, 1 * D:2 * D]      # per-head [real|imag] column layout
    v = qkv[:, 2 * D:3 * D]      # original interleaved layout (matches wo)

    # ---- rotary on full (S,D) slabs: q_rot = q*cos + swap_halves(q)*sin_signed ----
    c = cossin_ref[0]            # (S, D) cos tiled to the per-head layout
    s = cossin_ref[1]            # (S, D) signed sin: [-sin | +sin] per head

    def swap_halves(t):          # swap real<->imag 8-wide blocks within each head
        parts = []
        for h in range(n_heads):
            base = h * head_dim
            parts.append(t[:, base + half: base + head_dim])
            parts.append(t[:, base: base + half])
        return jnp.concatenate(parts, axis=-1)

    q_rot = q * c + swap_halves(q) * s
    k_rot = k * c + swap_halves(k) * s

    q16 = q_rot.astype(jnp.bfloat16)
    k16 = k_rot.astype(jnp.bfloat16)
    v16 = v.astype(jnp.bfloat16)

    # ---- causal mask built in-kernel (no HBM input / DMA) ----
    row = lax.broadcasted_iota(jnp.int32, (S, S), 0)
    col = lax.broadcasted_iota(jnp.int32, (S, S), 1)
    neg_mask = jnp.where(col <= row, 0.0, -1e30).astype(jnp.float32)

    # ---- per-head attention: one score dot per head, results kept in vregs ----
    dn = (((1,), (1,)), ((), ()))        # contract last dims: q @ k^T, no transpose
    heads_out = []
    for h in range(n_heads):
        lo = h * head_dim
        hi = lo + head_dim
        scores = lax.dot_general(q16[:, lo:hi], k16[:, lo:hi], dn,
                                 preferred_element_type=jnp.float32) + neg_mask
        m = jnp.max(scores, axis=-1, keepdims=True)
        e = jnp.exp(scores - m)
        p = e * pl.reciprocal(jnp.sum(e, axis=-1, keepdims=True), approx=True)
        heads_out.append(jnp.dot(p.astype(jnp.bfloat16), v16[:, lo:hi],
                                 preferred_element_type=jnp.float32))
    attn = jnp.concatenate(heads_out, axis=-1)     # (S, D), stays in vregs

    # ---- wo projection + residual (single lane-dense dot) ----
    hres = x + jnp.dot(attn.astype(jnp.bfloat16), wo_ref[...],
                       preferred_element_type=jnp.float32)

    # ---- FFN RMSNorm ----
    ms2 = jnp.mean(hres * hres, axis=-1, keepdims=True)
    hn = (hres * lax.rsqrt(ms2 + eps)) * fnw_ref[...]

    # ---- SwiGLU FFN: fused (w1|w3) up-projection, then w2 + residual ----
    h13 = jnp.dot(hn.astype(jnp.bfloat16), w13_ref[...],
                  preferred_element_type=jnp.float32)
    h1 = h13[:, :hidden]
    h3 = h13[:, hidden:]
    g = h1 * jax.nn.sigmoid(h1)      # SiLU (f32)
    out = hres + jnp.dot((g * h3).astype(jnp.bfloat16), w2_ref[...],
                         preferred_element_type=jnp.float32)

    o_ref[...] = out.astype(o_ref.dtype)


# ------------------------------- wrapper -----------------------------------------
def _full_spec(shape):
    n = len(shape)
    return pl.BlockSpec(shape, lambda i, _n=n: (0,) * _n)


def transformer_block(x, params, cossin):
    B, S, D = x.shape
    assert B == 1
    x2 = x[0]

    # rough advisory cost estimate (helps XLA schedule the custom call)
    flops = (2 * S * D * 3 * D                         # qkv
             + N_HEADS * (2 * S * S * HEAD_DIM         # scores
                          + 2 * S * S * HEAD_DIM)      # p @ v
             + 2 * S * D * D                           # wo
             + 2 * S * D * 2 * HIDDEN                  # w1|w3
             + 2 * S * HIDDEN * D)                     # w2
    transcendentals = N_HEADS * S * S + S * HIDDEN + 2 * S + N_HEADS * S
    bytes_accessed = (4 * (x2.size + params["attn_norm_w"].size
                           + params["ffn_norm_w"].size + cossin.size + S * D)
                      + 2 * (params["wqkv"].size + params["wo_t"].size
                             + params["w13_t"].size + params["w2_t"].size))

    out = pl.pallas_call(
        functools.partial(_block_kernel, n_heads=N_HEADS, head_dim=HEAD_DIM,
                          hidden=HIDDEN, eps=EPS),
        grid=(1,),
        in_specs=[
            _full_spec((S, D)),                  # x
            _full_spec((1, D)),                  # attention_norm weight (f32)
            _full_spec((D, 3 * D)),              # fused [wq|wk|wv]^T (bf16, permuted q/k)
            _full_spec((D, D)),                  # wo^T (bf16)
            _full_spec((1, D)),                  # ffn_norm weight (f32)
            _full_spec((D, 2 * HIDDEN)),         # fused [w1|w3]^T (bf16)
            _full_spec((HIDDEN, D)),             # w2^T (bf16)
            _full_spec((2, S, D)),               # packed [cos | signed sin] (f32)
        ],
        out_specs=_full_spec((S, D)),
        out_shape=jax.ShapeDtypeStruct((S, D), x.dtype),
        compiler_params=pltpu.CompilerParams(dimension_semantics=("arbitrary",)),
        cost_estimate=pl.CostEstimate(flops=int(flops),
                                      transcendentals=int(transcendentals),
                                      bytes_accessed=int(bytes_accessed)),
    )(x2, params["attn_norm_w"], params["wqkv"], params["wo_t"],
      params["ffn_norm_w"], params["w13_t"], params["w2_t"], cossin)
    return out[None]


# ------------------------------- reference (pure JAX, f32) -----------------------
def reference_block(x, wq, wk, wv, wo, w1, w2, w3, anw, fnw, cos, sin, mask):
    def rms(y, w):
        yf = y.astype(jnp.float32)
        ms = jnp.mean(yf * yf, axis=-1, keepdims=True)
        return (yf * lax.rsqrt(ms + EPS)).astype(y.dtype) * w

    B, S, D = x.shape
    xn = rms(x, anw)
    q = (xn @ wq.T).reshape(B, S, N_HEADS, HEAD_DIM)
    k = (xn @ wk.T).reshape(B, S, N_HEADS, HEAD_DIM)
    v = (xn @ wv.T).reshape(B, S, N_HEADS, HEAD_DIM)

    def rope(t_):  # torch interleaved complex rotary
        tr = t_[..., 0::2]
        ti = t_[..., 1::2]
        c = cos[None, :, None, :]
        s = sin[None, :, None, :]
        outr = tr * c - ti * s
        outi = tr * s + ti * c
        return jnp.stack([outr, outi], axis=-1).reshape(t_.shape)

    q = rope(q)
    k = rope(k)
    qh = q.transpose(0, 2, 1, 3)
    kh = k.transpose(0, 2, 1, 3)
    vh = v.transpose(0, 2, 1, 3)
    scores = jnp.einsum("bhqd,bhkd->bhqk", qh, kh) / math.sqrt(HEAD_DIM)
    scores = scores + mask[None, None]
    p = jax.nn.softmax(scores, axis=-1)
    attn = jnp.einsum("bhqk,bhkd->bhqd", p, vh)
    attn = attn.transpose(0, 2, 1, 3).reshape(B, S, N_HEADS * HEAD_DIM)
    h = x + attn @ wo.T
    hn = rms(h, fnw)
    ff = (jax.nn.silu(hn @ w1.T) * (hn @ w3.T)) @ w2.T
    return h + ff


# ------------------------------------ main ---------------------------------------
if __name__ == "__main__":
    key = jax.random.PRNGKey(0)
    ks = jax.random.split(key, 10)

    def init(k, shape, scale=0.05):
        return jax.random.normal(k, shape, dtype=jnp.float32) * scale

    # PyTorch nn.Linear weights: (out_features, in_features)
    wq = init(ks[0], (N_HEADS * HEAD_DIM, DIM))
    wk = init(ks[1], (N_HEADS * HEAD_DIM, DIM))
    wv = init(ks[2], (N_HEADS * HEAD_DIM, DIM))
    wo = init(ks[3], (DIM, N_HEADS * HEAD_DIM))
    w1 = init(ks[4], (HIDDEN, DIM))
    w2 = init(ks[5], (DIM, HIDDEN))
    w3 = init(ks[6], (HIDDEN, DIM))
    attn_norm_w = 1.0 + 0.01 * jax.random.normal(ks[7], (DIM,), dtype=jnp.float32)
    ffn_norm_w = 1.0 + 0.01 * jax.random.normal(ks[8], (DIM,), dtype=jnp.float32)
    x = jax.random.normal(ks[9], (BATCH, SEQ, DIM), dtype=jnp.float32)

    # rotary frequencies (same formula Llama uses to build freqs_cis)
    freqs = 1.0 / (
        ROPE_THETA ** (jnp.arange(0, HEAD_DIM, 2, dtype=jnp.float32) / HEAD_DIM)
    )
    t = jnp.arange(SEQ, dtype=jnp.float32)
    angles = jnp.outer(t, freqs)              # (SEQ, HEAD_DIM//2)
    cos = jnp.cos(angles)
    sin = jnp.sin(angles)

    # cos/sin expanded to the per-head [real(8)|imag(8)] column layout, packed as one
    # lane-dense (2, SEQ, DIM) input.  The sin slab carries the sign pattern
    # [-sin | +sin] so rope becomes q*cos + swap(q)*sin in the kernel.
    cos_ph = jnp.tile(jnp.concatenate([cos, cos], axis=1), (1, N_HEADS))   # (S, D)
    sin_ph = jnp.tile(jnp.concatenate([-sin, sin], axis=1), (1, N_HEADS))  # (S, D)
    cossin = jnp.stack([cos_ph, sin_ph], axis=0)                           # (2, S, D)

    # causal mask (reference only; the kernel builds it in-VMEM via iota)
    mask = jnp.triu(jnp.full((SEQ, SEQ), -1e30, dtype=jnp.float32), k=1)

    # column permutation taking wq/wk output features to the per-head-contiguous
    # rope layout [head h even (real) | head h odd (imag)]; identical perm for q
    # and k, so it cancels in q.k^T; v/wo stay in the original layout.
    heads = jnp.arange(N_HEADS)
    f_idx = jnp.arange(HALF)
    even = heads[:, None] * HEAD_DIM + 2 * f_idx[None, :]      # (H, HALF)
    perm = jnp.concatenate([even, even + 1], axis=1).reshape(-1)  # (DIM,)

    scale = 1.0 / math.sqrt(HEAD_DIM)
    params = dict(
        attn_norm_w=attn_norm_w.reshape(1, DIM),
        ffn_norm_w=ffn_norm_w.reshape(1, DIM),
        # 1/sqrt(head_dim) folded into the q columns; MXU operands stored as bf16.
        wqkv=jnp.concatenate([(scale * wq)[perm, :].T, wk[perm, :].T, wv.T],
                             axis=1).astype(jnp.bfloat16),      # (D, 3D)
        wo_t=wo.T.astype(jnp.bfloat16),                          # (D, D)
        w13_t=jnp.concatenate([w1.T, w3.T], axis=1).astype(jnp.bfloat16),  # (D, 2H)
        w2_t=w2.T.astype(jnp.bfloat16),                          # (H, D)
    )

    out = transformer_block(x, params, cossin)
    out = jax.block_until_ready(out)

    ref = reference_block(
        x, wq, wk, wv, wo, w1, w2, w3, attn_norm_w, ffn_norm_w, cos, sin, mask
    )
    assert out.shape == (BATCH, SEQ, DIM)
    # Tolerance accounts for bf16 MXU operands (f32 accumulation) vs. the f32 reference.
    assert jnp.allclose(out, ref, atol=2e-2, rtol=2e-2), (
        float(jnp.max(jnp.abs(out - ref)))
    )
    print("KERNEL_OK")
</pallas_src>

<mosaic_0001>
module attributes {stable_mosaic.version = 11 : i64} {
  func.func @_block_kernel(%arg0: i32, %arg1: memref<8x64xf32, #tpu.memory_space<vmem>>, %arg2: memref<1x64xf32, #tpu.memory_space<vmem>>, %arg3: memref<64x192xbf16, #tpu.memory_space<vmem>>, %arg4: memref<64x64xbf16, #tpu.memory_space<vmem>>, %arg5: memref<1x64xf32, #tpu.memory_space<vmem>>, %arg6: memref<64x128xbf16, #tpu.memory_space<vmem>>, %arg7: memref<64x64xbf16, #tpu.memory_space<vmem>>, %arg8: memref<2x8x64xf32, #tpu.memory_space<vmem>>, %arg9: memref<8x64xf32, #tpu.memory_space<vmem>>) attributes {dimension_semantics = [#tpu.dimension_semantics<arbitrary>], iteration_bounds = array<i64: 1>, scalar_prefetch = 0 : i64, scratch_operands = 0 : i64, tpu.core_type = #tpu.core_type<tc>, window_params = [{pipeline_mode = #tpu.pipeline_mode<synchronous>, transform_indices = @transform_0, window_bounds = array<i64: 8, 64>}, {pipeline_mode = #tpu.pipeline_mode<synchronous>, transform_indices = @transform_1, window_bounds = array<i64: 1, 64>}, {pipeline_mode = #tpu.pipeline_mode<synchronous>, transform_indices = @transform_2, window_bounds = array<i64: 64, 192>}, {pipeline_mode = #tpu.pipeline_mode<synchronous>, transform_indices = @transform_3, window_bounds = array<i64: 64, 64>}, {pipeline_mode = #tpu.pipeline_mode<synchronous>, transform_indices = @transform_4, window_bounds = array<i64: 1, 64>}, {pipeline_mode = #tpu.pipeline_mode<synchronous>, transform_indices = @transform_5, window_bounds = array<i64: 64, 128>}, {pipeline_mode = #tpu.pipeline_mode<synchronous>, transform_indices = @transform_6, window_bounds = array<i64: 64, 64>}, {pipeline_mode = #tpu.pipeline_mode<synchronous>, transform_indices = @transform_7, window_bounds = array<i64: 2, 8, 64>}, {pipeline_mode = #tpu.pipeline_mode<synchronous>, transform_indices = @transform_8, window_bounds = array<i64: 8, 64>}]} {
    %c0 = arith.constant 0 : index
    %c0_0 = arith.constant 0 : index
    %0 = vector.load %arg1[%c0, %c0_0] : memref<8x64xf32, #tpu.memory_space<vmem>>, vector<8x64xf32>
    %1 = arith.mulf %0, %0 : vector<8x64xf32>
    %cst = arith.constant dense<0.000000e+00> : vector<8xf32>
    %2 = vector.multi_reduction <add>, %1, %cst [1] : vector<8x64xf32> to vector<8xf32>
    %3 = vector.shape_cast %2 : vector<8xf32> to vector<8x1xf32>
    %cst_1 = arith.constant 6.400000e+01 : f32
    %4 = vector.broadcast %cst_1 : f32 to vector<8x1xf32>
    %5 = arith.divf %3, %4 : vector<8x1xf32>
    %cst_2 = arith.constant 9.99999974E-6 : f32
    %6 = vector.broadcast %cst_2 : f32 to vector<8x1xf32>
    %7 = arith.addf %5, %6 : vector<8x1xf32>
    %8 = math.rsqrt %7 : vector<8x1xf32>
    %9 = vector.broadcast %8 : vector<8x1xf32> to vector<8x64xf32>
    %10 = arith.mulf %0, %9 : vector<8x64xf32>
    %c0_3 = arith.constant 0 : index
    %c0_4 = arith.constant 0 : index
    %11 = vector.load %arg2[%c0_3, %c0_4] : memref<1x64xf32, #tpu.memory_space<vmem>>, vector<1x64xf32>
    %12 = vector.broadcast %11 : vector<1x64xf32> to vector<8x64xf32>
    %13 = arith.mulf %10, %12 : vector<8x64xf32>
    %14 = arith.truncf %13 : vector<8x64xf32> to vector<8x64xbf16>
    %c0_5 = arith.constant 0 : index
    %c0_6 = arith.constant 0 : index
    %15 = vector.load %arg3[%c0_5, %c0_6] : memref<64x192xbf16, #tpu.memory_space<vmem>>, vector<64x192xbf16>
    %cst_7 = arith.constant dense<0.000000e+00> : vector<8x192xf32>
    %16 = tpu.matmul %14, %15, %cst_7 {dimension_numbers = #tpu.dot_dimension_numbers<[1], [0], [0], [1], [0, 0, 1, 1], [], []>} : vector<8x64xbf16>, vector<64x192xbf16>, vector<8x192xf32> -> vector<8x192xf32>
    %17 = vector.extract_strided_slice %16 {offsets = [0, 0], sizes = [8, 64], strides = [1, 1]} : vector<8x192xf32> to vector<8x64xf32>
    %18 = vector.extract_strided_slice %16 {offsets = [0, 64], sizes = [8, 64], strides = [1, 1]} : vector<8x192xf32> to vector<8x64xf32>
    %19 = vector.extract_strided_slice %16 {offsets = [0, 128], sizes = [8, 64], strides = [1, 1]} : vector<8x192xf32> to vector<8x64xf32>
    %c0_8 = arith.constant 0 : index
    %c0_9 = arith.constant 0 : index
    %c0_10 = arith.constant 0 : index
    %20 = vector.load %arg8[%c0_8, %c0_9, %c0_10] : memref<2x8x64xf32, #tpu.memory_space<vmem>>, vector<1x8x64xf32>
    %21 = vector.shape_cast %20 : vector<1x8x64xf32> to vector<8x64xf32>
    %c1 = arith.constant 1 : index
    %c0_11 = arith.constant 0 : index
    %c0_12 = arith.constant 0 : index
    %22 = vector.load %arg8[%c1, %c0_11, %c0_12] : memref<2x8x64xf32, #tpu.memory_space<vmem>>, vector<1x8x64xf32>
    %23 = vector.shape_cast %22 : vector<1x8x64xf32> to vector<8x64xf32>
    %24 = arith.mulf %17, %21 : vector<8x64xf32>
    %25 = vector.extract_strided_slice %17 {offsets = [0, 8], sizes = [8, 8], strides = [1, 1]} : vector<8x64xf32> to vector<8x8xf32>
    %26 = vector.extract_strided_slice %17 {offsets = [0, 0], sizes = [8, 8], strides = [1, 1]} : vector<8x64xf32> to vector<8x8xf32>
    %27 = vector.extract_strided_slice %17 {offsets = [0, 24], sizes = [8, 8], strides = [1, 1]} : vector<8x64xf32> to vector<8x8xf32>
    %28 = vector.extract_strided_slice %17 {offsets = [0, 16], sizes = [8, 8], strides = [1, 1]} : vector<8x64xf32> to vector<8x8xf32>
    %29 = vector.extract_strided_slice %17 {offsets = [0, 40], sizes = [8, 8], strides = [1, 1]} : vector<8x64xf32> to vector<8x8xf32>
    %30 = vector.extract_strided_slice %17 {offsets = [0, 32], sizes = [8, 8], strides = [1, 1]} : vector<8x64xf32> to vector<8x8xf32>
    %31 = vector.extract_strided_slice %17 {offsets = [0, 56], sizes = [8, 8], strides = [1, 1]} : vector<8x64xf32> to vector<8x8xf32>
    %32 = vector.extract_strided_slice %17 {offsets = [0, 48], sizes = [8, 8], strides = [1, 1]} : vector<8x64xf32> to vector<8x8xf32>
    %33 = tpu.concatenate %25, %26, %27, %28, %29, %30, %31, %32 in 1 : vector<8x8xf32>, vector<8x8xf32>, vector<8x8xf32>, vector<8x8xf32>, vector<8x8xf32>, vector<8x8xf32>, vector<8x8xf32>, vector<8x8xf32> -> vector<8x64xf32>
    %34 = arith.mulf %33, %23 : vector<8x64xf32>
    %35 = arith.addf %24, %34 : vector<8x64xf32>
    %36 = arith.mulf %18, %21 : vector<8x64xf32>
    %37 = vector.extract_strided_slice %18 {offsets = [0, 8], sizes = [8, 8], strides = [1, 1]} : vector<8x64xf32> to vector<8x8xf32>
    %38 = vector.extract_strided_slice %18 {offsets = [0, 0], sizes = [8, 8], strides = [1, 1]} : vector<8x64xf32> to vector<8x8xf32>
    %39 = vector.extract_strided_slice %18 {offsets = [0, 24], sizes = [8, 8], strides = [1, 1]} : vector<8x64xf32> to vector<8x8xf32>
    %40 = vector.extract_strided_slice %18 {offsets = [0, 16], sizes = [8, 8], strides = [1, 1]} : vector<8x64xf32> to vector<8x8xf32>
    %41 = vector.extract_strided_slice %18 {offsets = [0, 40], sizes = [8, 8], strides = [1, 1]} : vector<8x64xf32> to vector<8x8xf32>
    %42 = vector.extract_strided_slice %18 {offsets = [0, 32], sizes = [8, 8], strides = [1, 1]} : vector<8x64xf32> to vector<8x8xf32>
    %43 = vector.extract_strided_slice %18 {offsets = [0, 56], sizes = [8, 8], strides = [1, 1]} : vector<8x64xf32> to vector<8x8xf32>
    %44 = vector.extract_strided_slice %18 {offsets = [0, 48], sizes = [8, 8], strides = [1, 1]} : vector<8x64xf32> to vector<8x8xf32>
    %45 = tpu.concatenate %37, %38, %39, %40, %41, %42, %43, %44 in 1 : vector<8x8xf32>, vector<8x8xf32>, vector<8x8xf32>, vector<8x8xf32>, vector<8x8xf32>, vector<8x8xf32>, vector<8x8xf32>, vector<8x8xf32> -> vector<8x64xf32>
    %46 = arith.mulf %45, %23 : vector<8x64xf32>
    %47 = arith.addf %36, %46 : vector<8x64xf32>
    %48 = arith.truncf %35 : vector<8x64xf32> to vector<8x64xbf16>
    %49 = arith.truncf %47 : vector<8x64xf32> to vector<8x64xbf16>
    %50 = arith.truncf %19 : vector<8x64xf32> to vector<8x64xbf16>
    %51 = tpu.iota {dimensions = array<i32: 0>} : vector<8x8xi32>
    %52 = tpu.iota {dimensions = array<i32: 1>} : vector<8x8xi32>
    %53 = arith.cmpi sle, %52, %51 : vector<8x8xi32>
    %cst_13 = arith.constant 0.000000e+00 : f32
    %cst_14 = arith.constant -1.000000e+30 : f32
    %54 = vector.broadcast %cst_13 : f32 to vector<8x8xf32>
    %55 = vector.broadcast %cst_14 : f32 to vector<8x8xf32>
    %56 = arith.select %53, %54, %55 : vector<8x8xi1>, vector<8x8xf32>
    %57 = vector.extract_strided_slice %48 {offsets = [0, 0], sizes = [8, 16], strides = [1, 1]} : vector<8x64xbf16> to vector<8x16xbf16>
    %58 = vector.extract_strided_slice %49 {offsets = [0, 0], sizes = [8, 16], strides = [1, 1]} : vector<8x64xbf16> to vector<8x16xbf16>
    %cst_15 = arith.constant dense<0.000000e+00> : vector<8x8xf32>
    %59 = tpu.matmul %57, %58, %cst_15 {dimension_numbers = #tpu.dot_dimension_numbers<[1], [1], [0], [0], [0, 0, 1, 0], [], []>} : vector<8x16xbf16>, vector<8x16xbf16>, vector<8x8xf32> -> vector<8x8xf32>
    %60 = arith.addf %59, %56 : vector<8x8xf32>
    %cst_16 = arith.constant dense<0xFF800000> : vector<8xf32>
    %61 = vector.multi_reduction <maximumf>, %60, %cst_16 [1] : vector<8x8xf32> to vector<8xf32>
    %62 = vector.shape_cast %61 : vector<8xf32> to vector<8x1xf32>
    %63 = vector.broadcast %62 : vector<8x1xf32> to vector<8x8xf32>
    %64 = arith.subf %60, %63 : vector<8x8xf32>
    %65 = math.exp %64 : vector<8x8xf32>
    %cst_17 = arith.constant dense<0.000000e+00> : vector<8xf32>
    %66 = vector.multi_reduction <add>, %65, %cst_17 [1] : vector<8x8xf32> to vector<8xf32>
    %67 = vector.shape_cast %66 : vector<8xf32> to vector<8x1xf32>
    %68 = tpu.reciprocal %67 {approx = true} : vector<8x1xf32> -> vector<8x1xf32>
    %69 = vector.broadcast %68 : vector<8x1xf32> to vector<8x8xf32>
    %70 = arith.mulf %65, %69 : vector<8x8xf32>
    %71 = arith.truncf %70 : vector<8x8xf32> to vector<8x8xbf16>
    %72 = vector.extract_strided_slice %50 {offsets = [0, 0], sizes = [8, 16], strides = [1, 1]} : vector<8x64xbf16> to vector<8x16xbf16>
    %cst_18 = arith.constant dense<0.000000e+00> : vector<8x16xf32>
    %73 = tpu.matmul %71, %72, %cst_18 {dimension_numbers = #tpu.dot_dimension_numbers<[1], [0], [0], [1], [0, 0, 1, 1], [], []>} : vector<8x8xbf16>, vector<8x16xbf16>, vector<8x16xf32> -> vector<8x16xf32>
    %74 = vector.extract_strided_slice %48 {offsets = [0, 16], sizes = [8, 16], strides = [1, 1]} : vector<8x64xbf16> to vector<8x16xbf16>
    %75 = vector.extract_strided_slice %49 {offsets = [0, 16], sizes = [8, 16], strides = [1, 1]} : vector<8x64xbf16> to vector<8x16xbf16>
    %cst_19 = arith.constant dense<0.000000e+00> : vector<8x8xf32>
    %76 = tpu.matmul %74, %75, %cst_19 {dimension_numbers = #tpu.dot_dimension_numbers<[1], [1], [0], [0], [0, 0, 1, 0], [], []>} : vector<8x16xbf16>, vector<8x16xbf16>, vector<8x8xf32> -> vector<8x8xf32>
    %77 = arith.addf %76, %56 : vector<8x8xf32>
    %cst_20 = arith.constant dense<0xFF800000> : vector<8xf32>
    %78 = vector.multi_reduction <maximumf>, %77, %cst_20 [1] : vector<8x8xf32> to vector<8xf32>
    %79 = vector.shape_cast %78 : vector<8xf32> to vector<8x1xf32>
    %80 = vector.broadcast %79 : vector<8x1xf32> to vector<8x8xf32>
    %81 = arith.subf %77, %80 : vector<8x8xf32>
    %82 = math.exp %81 : vector<8x8xf32>
    %cst_21 = arith.constant dense<0.000000e+00> : vector<8xf32>
    %83 = vector.multi_reduction <add>, %82, %cst_21 [1] : vector<8x8xf32> to vector<8xf32>
    %84 = vector.shape_cast %83 : vector<8xf32> to vector<8x1xf32>
    %85 = tpu.reciprocal %84 {approx = true} : vector<8x1xf32> -> vector<8x1xf32>
    %86 = vector.broadcast %85 : vector<8x1xf32> to vector<8x8xf32>
    %87 = arith.mulf %82, %86 : vector<8x8xf32>
    %88 = arith.truncf %87 : vector<8x8xf32> to vector<8x8xbf16>
    %89 = vector.extract_strided_slice %50 {offsets = [0, 16], sizes = [8, 16], strides = [1, 1]} : vector<8x64xbf16> to vector<8x16xbf16>
    %cst_22 = arith.constant dense<0.000000e+00> : vector<8x16xf32>
    %90 = tpu.matmul %88, %89, %cst_22 {dimension_numbers = #tpu.dot_dimension_numbers<[1], [0], [0], [1], [0, 0, 1, 1], [], []>} : vector<8x8xbf16>, vector<8x16xbf16>, vector<8x16xf32> -> vector<8x16xf32>
    %91 = vector.extract_strided_slice %48 {offsets = [0, 32], sizes = [8, 16], strides = [1, 1]} : vector<8x64xbf16> to vector<8x16xbf16>
    %92 = vector.extract_strided_slice %49 {offsets = [0, 32], sizes = [8, 16], strides = [1, 1]} : vector<8x64xbf16> to vector<8x16xbf16>
    %cst_23 = arith.constant dense<0.000000e+00> : vector<8x8xf32>
    %93 = tpu.matmul %91, %92, %cst_23 {dimension_numbers = #tpu.dot_dimension_numbers<[1], [1], [0], [0], [0, 0, 1, 0], [], []>} : vector<8x16xbf16>, vector<8x16xbf16>, vector<8x8xf32> -> vector<8x8xf32>
    %94 = arith.addf %93, %56 : vector<8x8xf32>
    %cst_24 = arith.constant dense<0xFF800000> : vector<8xf32>
    %95 = vector.multi_reduction <maximumf>, %94, %cst_24 [1] : vector<8x8xf32> to vector<8xf32>
    %96 = vector.shape_cast %95 : vector<8xf32> to vector<8x1xf32>
    %97 = vector.broadcast %96 : vector<8x1xf32> to vector<8x8xf32>
    %98 = arith.subf %94, %97 : vector<8x8xf32>
    %99 = math.exp %98 : vector<8x8xf32>
    %cst_25 = arith.constant dense<0.000000e+00> : vector<8xf32>
    %100 = vector.multi_reduction <add>, %99, %cst_25 [1] : vector<8x8xf32> to vector<8xf32>
    %101 = vector.shape_cast %100 : vector<8xf32> to vector<8x1xf32>
    %102 = tpu.reciprocal %101 {approx = true} : vector<8x1xf32> -> vector<8x1xf32>
    %103 = vector.broadcast %102 : vector<8x1xf32> to vector<8x8xf32>
    %104 = arith.mulf %99, %103 : vector<8x8xf32>
    %105 = arith.truncf %104 : vector<8x8xf32> to vector<8x8xbf16>
    %106 = vector.extract_strided_slice %50 {offsets = [0, 32], sizes = [8, 16], strides = [1, 1]} : vector<8x64xbf16> to vector<8x16xbf16>
    %cst_26 = arith.constant dense<0.000000e+00> : vector<8x16xf32>
    %107 = tpu.matmul %105, %106, %cst_26 {dimension_numbers = #tpu.dot_dimension_numbers<[1], [0], [0], [1], [0, 0, 1, 1], [], []>} : vector<8x8xbf16>, vector<8x16xbf16>, vector<8x16xf32> -> vector<8x16xf32>
    %108 = vector.extract_strided_slice %48 {offsets = [0, 48], sizes = [8, 16], strides = [1, 1]} : vector<8x64xbf16> to vector<8x16xbf16>
    %109 = vector.extract_strided_slice %49 {offsets = [0, 48], sizes = [8, 16], strides = [1, 1]} : vector<8x64xbf16> to vector<8x16xbf16>
    %cst_27 = arith.constant dense<0.000000e+00> : vector<8x8xf32>
    %110 = tpu.matmul %108, %109, %cst_27 {dimension_numbers = #tpu.dot_dimension_numbers<[1], [1], [0], [0], [0, 0, 1, 0], [], []>} : vector<8x16xbf16>, vector<8x16xbf16>, vector<8x8xf32> -> vector<8x8xf32>
    %111 = arith.addf %110, %56 : vector<8x8xf32>
    %cst_28 = arith.constant dense<0xFF800000> : vector<8xf32>
    %112 = vector.multi_reduction <maximumf>, %111, %cst_28 [1] : vector<8x8xf32> to vector<8xf32>
    %113 = vector.shape_cast %112 : vector<8xf32> to vector<8x1xf32>
    %114 = vector.broadcast %113 : vector<8x1xf32> to vector<8x8xf32>
    %115 = arith.subf %111, %114 : vector<8x8xf32>
    %116 = math.exp %115 : vector<8x8xf32>
    %cst_29 = arith.constant dense<0.000000e+00> : vector<8xf32>
    %117 = vector.multi_reduction <add>, %116, %cst_29 [1] : vector<8x8xf32> to vector<8xf32>
    %118 = vector.shape_cast %117 : vector<8xf32> to vector<8x1xf32>
    %119 = tpu.reciprocal %118 {approx = true} : vector<8x1xf32> -> vector<8x1xf32>
    %120 = vector.broadcast %119 : vector<8x1xf32> to vector<8x8xf32>
    %121 = arith.mulf %116, %120 : vector<8x8xf32>
    %122 = arith.truncf %121 : vector<8x8xf32> to vector<8x8xbf16>
    %123 = vector.extract_strided_slice %50 {offsets = [0, 48], sizes = [8, 16], strides = [1, 1]} : vector<8x64xbf16> to vector<8x16xbf16>
    %cst_30 = arith.constant dense<0.000000e+00> : vector<8x16xf32>
    %124 = tpu.matmul %122, %123, %cst_30 {dimension_numbers = #tpu.dot_dimension_numbers<[1], [0], [0], [1], [0, 0, 1, 1], [], []>} : vector<8x8xbf16>, vector<8x16xbf16>, vector<8x16xf32> -> vector<8x16xf32>
    %125 = tpu.concatenate %73, %90, %107, %124 in 1 : vector<8x16xf32>, vector<8x16xf32>, vector<8x16xf32>, vector<8x16xf32> -> vector<8x64xf32>
    %126 = arith.truncf %125 : vector<8x64xf32> to vector<8x64xbf16>
    %c0_31 = arith.constant 0 : index
    %c0_32 = arith.constant 0 : index
    %127 = vector.load %arg4[%c0_31, %c0_32] : memref<64x64xbf16, #tpu.memory_space<vmem>>, vector<64x64xbf16>
    %cst_33 = arith.constant dense<0.000000e+00> : vector<8x64xf32>
    %128 = tpu.matmul %126, %127, %cst_33 {dimension_numbers = #tpu.dot_dimension_numbers<[1], [0], [0], [1], [0, 0, 1, 1], [], []>} : vector<8x64xbf16>, vector<64x64xbf16>, vector<8x64xf32> -> vector<8x64xf32>
    %129 = arith.addf %0, %128 : vector<8x64xf32>
    %130 = arith.mulf %129, %129 : vector<8x64xf32>
    %cst_34 = arith.constant dense<0.000000e+00> : vector<8xf32>
    %131 = vector.multi_reduction <add>, %130, %cst_34 [1] : vector<8x64xf32> to vector<8xf32>
    %132 = vector.shape_cast %131 : vector<8xf32> to vector<8x1xf32>
    %cst_35 = arith.constant 6.400000e+01 : f32
    %133 = vector.broadcast %cst_35 : f32 to vector<8x1xf32>
    %134 = arith.divf %132, %133 : vector<8x1xf32>
    %cst_36 = arith.constant 9.99999974E-6 : f32
    %135 = vector.broadcast %cst_36 : f32 to vector<8x1xf32>
    %136 = arith.addf %134, %135 : vector<8x1xf32>
    %137 = math.rsqrt %136 : vector<8x1xf32>
    %138 = vector.broadcast %137 : vector<8x1xf32> to vector<8x64xf32>
    %139 = arith.mulf %129, %138 : vector<8x64xf32>
    %c0_37 = arith.constant 0 : index
    %c0_38 = arith.constant 0 : index
    %140 = vector.load %arg5[%c0_37, %c0_38] : memref<1x64xf32, #tpu.memory_space<vmem>>, vector<1x64xf32>
    %141 = vector.broadcast %140 : vector<1x64xf32> to vector<8x64xf32>
    %142 = arith.mulf %139, %141 : vector<8x64xf32>
    %143 = arith.truncf %142 : vector<8x64xf32> to vector<8x64xbf16>
    %c0_39 = arith.constant 0 : index
    %c0_40 = arith.constant 0 : index
    %144 = vector.load %arg6[%c0_39, %c0_40] : memref<64x128xbf16, #tpu.memory_space<vmem>>, vector<64x128xbf16>
    %cst_41 = arith.constant dense<0.000000e+00> : vector<8x128xf32>
    %145 = tpu.matmul %143, %144, %cst_41 {dimension_numbers = #tpu.dot_dimension_numbers<[1], [0], [0], [1], [0, 0, 1, 1], [], []>} : vector<8x64xbf16>, vector<64x128xbf16>, vector<8x128xf32> -> vector<8x128xf32>
    %146 = vector.extract_strided_slice %145 {offsets = [0, 0], sizes = [8, 64], strides = [1, 1]} : vector<8x128xf32> to vector<8x64xf32>
    %147 = vector.extract_strided_slice %145 {offsets = [0, 64], sizes = [8, 64], strides = [1, 1]} : vector<8x128xf32> to vector<8x64xf32>
    %148 = arith.negf %146 : vector<8x64xf32>
    %149 = math.exp %148 : vector<8x64xf32>
    %cst_42 = arith.constant 1.000000e+00 : f32
    %150 = vector.broadcast %cst_42 : f32 to vector<8x64xf32>
    %151 = arith.addf %150, %149 : vector<8x64xf32>
    %152 = arith.divf %150, %151 : vector<8x64xf32>
    %153 = arith.mulf %146, %152 : vector<8x64xf32>
    %154 = arith.mulf %153, %147 : vector<8x64xf32>
    %155 = arith.truncf %154 : vector<8x64xf32> to vector<8x64xbf16>
    %c0_43 = arith.constant 0 : index
    %c0_44 = arith.constant 0 : index
    %156 = vector.load %arg7[%c0_43, %c0_44] : memref<64x64xbf16, #tpu.memory_space<vmem>>, vector<64x64xbf16>
    %cst_45 = arith.constant dense<0.000000e+00> : vector<8x64xf32>
    %157 = tpu.matmul %155, %156, %cst_45 {dimension_numbers = #tpu.dot_dimension_numbers<[1], [0], [0], [1], [0, 0, 1, 1], [], []>} : vector<8x64xbf16>, vector<64x64xbf16>, vector<8x64xf32> -> vector<8x64xf32>
    %158 = arith.addf %129, %157 : vector<8x64xf32>
    %c0_46 = arith.constant 0 : index
    %c0_47 = arith.constant 0 : index
    %159 = vector.load %arg9[%c0_46, %c0_47] : memref<8x64xf32, #tpu.memory_space<vmem>>, vector<8x64xf32>
    tpu.vector_store %arg9[%c0_46, %c0_47], %158 {strides = array<i32>} : memref<8x64xf32, #tpu.memory_space<vmem>>, vector<8x64xf32>,
    return
  }
  func.func @transform_0(%arg0: i32) -> (i32, i32) {
    %c0_i32 = arith.constant 0 : i32
    %c0_i32_0 = arith.constant 0 : i32
    %c0_i32_1 = arith.constant 0 : i32
    return %c0_i32, %c0_i32_0 : i32, i32
  }
  func.func @transform_1(%arg0: i32) -> (i32, i32) {
    %c0_i32 = arith.constant 0 : i32
    %c0_i32_0 = arith.constant 0 : i32
    %c0_i32_1 = arith.constant 0 : i32
    return %c0_i32, %c0_i32_0 : i32, i32
  }
  func.func @transform_2(%arg0: i32) -> (i32, i32) {
    %c0_i32 = arith.constant 0 : i32
    %c0_i32_0 = arith.constant 0 : i32
    %c0_i32_1 = arith.constant 0 : i32
    return %c0_i32, %c0_i32_0 : i32, i32
  }
  func.func @transform_3(%arg0: i32) -> (i32, i32) {
    %c0_i32 = arith.constant 0 : i32
    %c0_i32_0 = arith.constant 0 : i32
    %c0_i32_1 = arith.constant 0 : i32
    return %c0_i32, %c0_i32_0 : i32, i32
  }
  func.func @transform_4(%arg0: i32) -> (i32, i32) {
    %c0_i32 = arith.constant 0 : i32
    %c0_i32_0 = arith.constant 0 : i32
    %c0_i32_1 = arith.constant 0 : i32
    return %c0_i32, %c0_i32_0 : i32, i32
  }
  func.func @transform_5(%arg0: i32) -> (i32, i32) {
    %c0_i32 = arith.constant 0 : i32
    %c0_i32_0 = arith.constant 0 : i32
    %c0_i32_1 = arith.constant 0 : i32
    return %c0_i32, %c0_i32_0 : i32, i32
  }
  func.func @transform_6(%arg0: i32) -> (i32, i32) {
    %c0_i32 = arith.constant 0 : i32
    %c0_i32_0 = arith.constant 0 : i32
    %c0_i32_1 = arith.constant 0 : i32
    return %c0_i32, %c0_i32_0 : i32, i32
  }
  func.func @transform_7(%arg0: i32) -> (i32, i32, i32) {
    %c0_i32 = arith.constant 0 : i32
    %c0_i32_0 = arith.constant 0 : i32
    %c0_i32_1 = arith.constant 0 : i32
    %c0_i32_2 = arith.constant 0 : i32
    return %c0_i32, %c0_i32_0, %c0_i32_1 : i32, i32, i32
  }
  func.func @transform_8(%arg0: i32) -> (i32, i32) {
    %c0_i32 = arith.constant 0 : i32
    %c0_i32_0 = arith.constant 0 : i32
    %c0_i32_1 = arith.constant 0 : i32
    return %c0_i32, %c0_i32_0 : i32, i32
  }
}

</mosaic_0001>

<bundles_post_ra>
// kernel: tpu_custom_call.1
= control target key start
LH: loop header
LB: loop body
LE: loop exit
PB: predicated region body
PF: predicated region fallthrough
CT: control target
= control target key end

     0   :  { %13 = vsyncpa [#allocation3], 0  ;;  %s1652_s0 = inlined_call_operand.hbm [shape: f32[8,64], index: 0, kind: input, shape index: {}]   ;;  %s1653_s1 = inlined_call_operand.vmem [shape: f32[1,64], index: 1, kind: input, shape index: {}]   ;;  %s1654_s2 = inlined_call_operand.hbm [shape: bf16[64,192], index: 2, kind: input, shape index: {}]   ;;  %s1655_s3 = inlined_call_operand.hbm [shape: bf16[64,64], index: 3, kind: input, shape index: {}]   ;;  %s1656_s4 = inlined_call_operand.vmem [shape: f32[1,64], index: 4, kind: input, shape index: {}]   ;;  %s1657_s5 = inlined_call_operand.hbm [shape: bf16[64,128], index: 5, kind: input, shape index: {}]   ;;  %s1658_s6 = inlined_call_operand.hbm [shape: bf16[64,64], index: 6, kind: input, shape index: {}]   ;;  %s1659_s7 = inlined_call_operand.vmem [shape: f32[2,8,64], index: 7, kind: input, shape index: {}]   ;;  %s1660_s8 = inlined_call_operand.hbm [shape: f32[8,64], index: 8, kind: output, shape index: {}]  }
   0x1   :  { %14 = vsyncpa [#allocation6], 0 }
   0x2   :  { %15 = vsyncpa [#allocation9], 0 }
   0x3   :  { %16 = vsyncpa [#allocation4], 0  ;;  %s1362_s27 = smov [#allocation5]   ;;  %s1222_s9 = scalar_lea.hbm %s1654_s2, 1024 }
   0x4   :  { %s34_s28 = sshll.u32 %s1362_s27, 4  ;;  %p1223_p0 = scmp.ne.s32.totalorder %s1654_s2, %s1222_s9  ;;  %s35_s28 = int_to_ptr.vmem [resolvable:$true] %s34_s28 }
   0x5   :  { %p1226_p1 = scmp.lt.u32.totalorder %s1222_s9, %s1654_s2 }
   0x7   :  { %p1228_p2 = pnand %p1226_p1, %p1223_p0 }
   0x9   :  { %1231 = shalt.err (!%p1228_p2)
}
   0xa   :  { %s1232_s14 = scalar_lea.vmem %s35_s28, 1024  ;;  %p1237_p4 = scmp.lt.s32.totalorder %s35_s28, %s35_s28 }
   0xb   :  { %p1233_p3 = scmp.ne.s32.totalorder %s35_s28, %s1232_s14  ;;  %p1238_p5 = scmp.lt.s32.totalorder %s1232_s14, %s1232_s14 }
   0xd   :  { %p1239_p6 = por %p1238_p5, %p1237_p4 }
   0xf   :  { %p1240_p7 = pnand %p1239_p6, %p1233_p3 }
  0x11   :  { %1243 = shalt.err (!%p1240_p7)
}
  0x12   :  { %s1363_s15 = smov 128   ;;  %s1364_s16 = smov 8  }
  0x13   :  { %40 = dma.hbm_to_vmem [thread:$0]  %s1654_s2, 1024, %s35_s28, [#allocation6], %s1363_s15, %s1363_s15, %s1364_s16  }
  0x14   :  { %s1365_s19 = smov [#allocation8]   ;;  %s1366_s21 = smov [#allocation2]  }
  0x15   :  { %s60_s20 = sshll.u32 %s1365_s19, 4  ;;  %s23_s22 = sshll.u32 %s1366_s21, 4  ;;  %s61_s20 = int_to_ptr.vmem [resolvable:$true] %s60_s20  ;;  %s24_s22 = int_to_ptr.vmem [resolvable:$true] %s23_s22 }
  0x16   :  { %s1244_s25 = scalar_lea.hbm %s1657_s5, 512 }
  0x17   :  { %p1245_p8 = scmp.ne.s32.totalorder %s1657_s5, %s1244_s25  ;;  %p1248_p9 = scmp.lt.u32.totalorder %s1244_s25, %s1657_s5 }
  0x19   :  { %p1250_p10 = pnand %p1248_p9, %p1245_p8 }
  0x1b   :  { %1253 = shalt.err (!%p1250_p10)
}
  0x1c   :  { %s1254_s2 = scalar_lea.vmem %s61_s20, 512  ;;  %p1259_p12 = scmp.lt.s32.totalorder %s61_s20, %s61_s20 }
  0x1d   :  { %p1255_p11 = scmp.ne.s32.totalorder %s61_s20, %s1254_s2  ;;  %p1260_p13 = scmp.lt.s32.totalorder %s1254_s2, %s1254_s2 }
  0x1f   :  { %p1261_p0 = por %p1260_p13, %p1259_p12 }
  0x21   :  { %p1262_p1 = pnand %p1261_p0, %p1255_p11 }
  0x23   :  { %1265 = shalt.err (!%p1262_p1)
}
  0x24   :  { %s1367_s28 = smov 64   ;;  %s1368_s9 = smov 4  }
  0x25   :  { %66 = dma.hbm_to_vmem [thread:$0]  %s1657_s5, 512, %s61_s20, [#allocation9], %s1367_s28, %s1367_s28, %s1368_s9  }
  0x26   :  { %s1266_s14 = scalar_lea.hbm %s1652_s0, 128 }
  0x27   :  { %p1267_p2 = scmp.ne.s32.totalorder %s1652_s0, %s1266_s14  ;;  %p1270_p3 = scmp.lt.u32.totalorder %s1266_s14, %s1652_s0 }
  0x29   :  { %p1272_p4 = pnand %p1270_p3, %p1267_p2 }
  0x2b   :  { %1275 = shalt.err (!%p1272_p4)
}
  0x2c   :  { %s1276_s21 = scalar_lea.vmem %s24_s22, 128  ;;  %p1281_p6 = scmp.lt.s32.totalorder %s24_s22, %s24_s22 }
  0x2d   :  { %p1277_p5 = scmp.ne.s32.totalorder %s24_s22, %s1276_s21  ;;  %p1282_p7 = scmp.lt.s32.totalorder %s1276_s21, %s1276_s21 }
  0x2f   :  { %p1283_p8 = por %p1282_p7, %p1281_p6 }
  0x31   :  { %p1284_p9 = pnand %p1283_p8, %p1277_p5 }
  0x33   :  { %1287 = shalt.err (!%p1284_p9)
}
  0x34   :  { %26 = dma.hbm_to_vmem [thread:$0]  %s1652_s0, 128, %s24_s22, [#allocation3]  }
  0x35   :  { %s1369_s23 = smov [#allocation7]   ;;  %s1370_s25 = smov [#allocation10]  }
  0x36   :  { %s46_s24 = sshll.u32 %s1369_s23, 4  ;;  %s72_s26 = sshll.u32 %s1370_s25, 4  ;;  %s47_s24 = int_to_ptr.vmem [resolvable:$true] %s46_s24  ;;  %s73_s26 = int_to_ptr.vmem [resolvable:$true] %s72_s26 }
  0x37   :  { %s1288_s30 = scalar_lea.hbm %s1655_s3, 512 }
  0x38   :  { %p1289_p10 = scmp.ne.s32.totalorder %s1655_s3, %s1288_s30  ;;  %p1292_p11 = scmp.lt.u32.totalorder %s1288_s30, %s1655_s3 }
  0x3a   :  { %p1294_p12 = pnand %p1292_p11, %p1289_p10 }
  0x3c   :  { %1297 = shalt.err (!%p1294_p12)
}
  0x3d   :  { %s1298_s0 = scalar_lea.vmem %s47_s24, 512  ;;  %p1303_p0 = scmp.lt.s32.totalorder %s47_s24, %s47_s24 }
  0x3e   :  { %p1299_p13 = scmp.ne.s32.totalorder %s47_s24, %s1298_s0  ;;  %p1304_p1 = scmp.lt.s32.totalorder %s1298_s0, %s1298_s0 }
  0x40   :  { %p1305_p2 = por %p1304_p1, %p1303_p0 }
  0x42   :  { %p1306_p3 = pnand %p1305_p2, %p1299_p13 }
  0x44   :  { %1309 = shalt.err (!%p1306_p3)
}
  0x45   :  { %52 = dma.hbm_to_vmem [thread:$0]  %s1655_s3, 512, %s47_s24, [#allocation6], %s1367_s28, %s1367_s28, %s1368_s9  }
  0x46   :  { %s1310_s17 = scalar_lea.hbm %s1658_s6, 512 }
  0x47   :  { %p1311_p4 = scmp.ne.s32.totalorder %s1658_s6, %s1310_s17  ;;  %p1314_p5 = scmp.lt.u32.totalorder %s1310_s17, %s1658_s6 }
  0x49   :  { %p1316_p6 = pnand %p1314_p5, %p1311_p4 }
  0x4b   :  { %1319 = shalt.err (!%p1316_p6)
}
  0x4c   :  { %s1320_s20 = scalar_lea.vmem %s73_s26, 512  ;;  %p1325_p8 = scmp.lt.s32.totalorder %s73_s26, %s73_s26 }
  0x4d   :  { %p1321_p7 = scmp.ne.s32.totalorder %s73_s26, %s1320_s20  ;;  %p1326_p9 = scmp.lt.s32.totalorder %s1320_s20, %s1320_s20 }
  0x4f   :  { %p1327_p10 = por %p1326_p9, %p1325_p8 }
  0x51   :  { %p1328_p11 = pnand %p1327_p10, %p1321_p7 }
  0x53   :  { %1331 = shalt.err (!%p1328_p11)
}
  0x54   :  { %78 = dma.hbm_to_vmem [thread:$0]  %s1658_s6, 512, %s73_s26, [#allocation9], %s1367_s28, %s1367_s28, %s1368_s9  }
  0x55   :  { %1354 = dma.done.wait [#allocation3], 128  }
  0x56   :  { %1355 = vsyncadd [#allocation3], 4294967168 }
  0x57   :  { %1356 = dma.done.wait [#allocation6], 1536  }
  0x58   :  { %1357 = vsyncadd [#allocation6], 4294965760 }
  0x59   :  { %1358 = dma.done.wait [#allocation9], 1024  }
  0x5a   :  { %1359 = vsyncadd [#allocation9], 4294966272  ;;  %v1500_v0 = vld [vmem:[#allocation2] sm:$0xff]  ;;  %vm99_vm0 = vcmask 523264   ;;  %v1174_v3 = vld [vmem:[#allocation5 + $0x4] ss:$8 sps:$4 sm:$0xff]   ;;  %v263_v59 = vlaneseq }
  0x5b   :  { %v98_v1 = vmul.f32 %v1500_v0, %v1500_v0  ;;  %v1176_v4 = vld [vmem:[#allocation5] ss:$8 sps:$4 sm:$0xff]   ;;  %v1177_v5 = vld [vmem:[#allocation5 + $0x14] ss:$8 sps:$4 sm:$0xff]   ;;  %168 = vmatprep.subr.bf16.mxu0 %v1174_v3  ;;  %v1179_v6 = vld [vmem:[#allocation5 + $0x10] ss:$8 sps:$4 sm:$0xff]  }
  0x5c   :  { %169 = vmatpush1.bf16.msra.mxu0 %v1176_v4  ;;  %v1180_v7 = vld [vmem:[#allocation5 + $0x24] ss:$8 sps:$4 sm:$0xff]   ;;  %v1371_v8 = vmov 0   ;;  %v1182_v9 = vld [vmem:[#allocation5 + $0x20] ss:$8 sps:$4 sm:$0xff]   ;;  %s1372_s26 = smov 72  }
  0x5d   :  { %v100_v2 = vsel %vm99_vm0, %v98_v1, 0.0  ;;  %170 = vmatprep.subr.bf16.mxu0 %v1177_v5  ;;  %200 = vmatprep.mubr.bf16.mxu0 %v1371_v8  ;;  %v1183_v10 = vld [vmem:[#allocation5 + $0x34] ss:$8 sps:$4 sm:$0xff]   ;;  %v1185_v11 = vld [vmem:[#allocation5 + $0x30] ss:$8 sps:$4 sm:$0xff]   ;;  %v209_v20 = vld [vmem:[%s1659_s7] sm:$0xff] }
  0x5e   :  { %101 = vadd.xlane.f32.xlu0 %v100_v2  ;;  %v1000_v16 = vld [vmem:[%s1653_s1] ss:$0 sm:$0xff]  ;;  %s1373_s27 = smov 56   ;;  %vm220_vm1 = vcmask 64512   ;;  %vm222_vm2 = vcmask 130048   ;;  %vm224_vm3 = vcmask 195584  }
  0x5f   :  { %vm226_vm4 = vcmask 261120   ;;  %vm228_vm5 = vcmask 326656   ;;  %vm230_vm6 = vcmask 392192   ;;  %vm232_vm7 = vcmask 457728   ;;  %v1010_v32 = vld [vmem:[%s1659_s7 + $0x8] sm:$0xff]  ;;  %s1374_s30 = smov 120  }
  0x60   :  { %171 = vmatpush1.bf16.msra.mxu0 %v1179_v6  ;;  %v1375_v37 = vmov 0.0   ;;  %vm1376_vm8 = vmmov 0   ;;  %vm333_vm9 = vcmask 1043456   ;;  %v264_v60 = vshrl.u32 %v263_v59, 7  ;;  %s1378_s7 = smov 112   ;;  %s1380_s2 = smov 16  }
  0x61   :  { %172 = vmatprep.subr.bf16.mxu0 %v1180_v7  ;;  %1067 = vmatprep.subr.bf16.mxu1 %v1375_v37  ;;  %v266_v61 = vand.u32 127, %v263_v59  ;;  %v1377_v62 = vmov -1e+30   ;;  %s1381_s10 = smov 48   ;;  %s1382_s11 = smov 96  }
  0x62   :  { %1069 = vmatprep.mubr.msk.bf16.mxu1 %vm1376_vm8, %v1375_v37  ;;  %s1383_s12 = smov 80  }
  0x63   :  { %vm267_vm10 = vcmp.le.s32.totalorder %v266_v61, %v264_v60 }
  0x64   :  { %173 = vmatpush1.bf16.msra.mxu0 %v1182_v9  ;;  %v1550_v63 = vsel %vm267_vm10, 0.0, %v1377_v62 }
  0x65   :  { %174 = vmatprep.subr.bf16.mxu0 %v1183_v10 }
  0x68   :  { %175 = vmatpush1.bf16.msra.mxu0 %v1185_v11 }
  0x69   :  { %1091 = vmatprep.subr.bf16.mxu0 %v1375_v37 }
  0xeb   :  { %v102_v12 = vpop.xlane.xlu0 %101 }
  0xec   :  { %v104_v13 = vmul.f32 0.015625, %v102_v12 }
  0xee   :  { %v105_v14 = vadd.f32 1e-05, %v104_v13 }
  0xf0   :  { %1198 = vrsqrt.f32 %v105_v14 }
  0xfa   :  { %v1199_v15 = vpop.eup %1198 }
  0xfb   :  { %v107_v17 = vmul.f32 %v1199_v15, %v1500_v0 }
  0xfd   :  { %v115_v18 = vmul.f32 %v1000_v16, %v107_v17 }
  0xff   :  { %v116_v19 = vpack.c.bf16 %v115_v18, %v115_v18 }
 0x101   :  { %1009 = vmatmul.mubr.msk.bf16.vlgmr.msra.gmra.mrb[0].mxu0 %vm99_vm0, %v116_v19 }
 0x102   :  { %1093 = vmatprep.mubr.msk.bf16.mxu0 %vm1376_vm8, %v1375_v37 }
 0x1d4   :  { %v202_v21 = vpop.f32.mrb[0].mxu0 }
 0x1d5   :  { %244 = vrot.lane.b32.xlu1 %v202_v21, %s1372_s26  ;;  %241 = vrot.lane.b32.xlu0 %v202_v21, %s1373_s27  ;;  %v204_v22 = vpop.f32.mrb[1].mxu0  ;;  %v212_v23 = vmul.f32 %v209_v20, %v202_v21 }
 0x1d6   :  { %v206_v24 = vpop.f32.mrb[2].mxu0  ;;  %v1542_v56 = vpack.c.bf16 %v204_v22, %v204_v22 }
 0x1d7   :  { %v207_v25 = vpop.f32.mrb[3].mxu0 }
 0x1d8   :  { %v335_v58 = vsel %vm333_vm9, %v1542_v56, 0 }
 0x1d9   :  { %237 = vrot.lane.b32.xlu1 %v209_v20, %s1367_s28 }
 0x247   :  { %v245_v26 = vpop.permute.xlu1 %244  ;;  %v242_v27 = vpop.permute.xlu0 %241 }
 0x248   :  { %v247_v28 = vsel %vm220_vm1, %v242_v27, %v245_v26 }
 0x249   :  { %v248_v29 = vsel %vm222_vm2, %v247_v28, %v242_v27 }
 0x24a   :  { %v249_v30 = vsel %vm224_vm3, %v248_v29, %v245_v26 }
 0x24b   :  { %v250_v31 = vsel %vm226_vm4, %v249_v30, %v242_v27  ;;  %v238_v38 = vpop.permute.xlu1 %237 }
 0x24c   :  { %v251_v33 = vsel %vm228_vm5, %v250_v31, %v245_v26  ;;  %v240_v39 = vmul.f32 %v238_v38, %v202_v21 }
 0x24d   :  { %v252_v34 = vsel %vm230_vm6, %v251_v33, %v242_v27 }
 0x24e   :  { %v253_v35 = vsel %vm232_vm7, %v252_v34, %v245_v26 }
 0x24f   :  { %v254_v36 = vmul.f32 %v1010_v32, %v253_v35 }
 0x251   :  { %256 = vrot.lane.b32.xlu1 %v254_v36, %s1367_s28 }
 0x255   :  { %214 = vrot.lane.b32.xlu1 %v202_v21, %s1374_s30 }
 0x259   :  { %217 = vrot.lane.b32.xlu1 %v202_v21, %s1364_s16  ;;  %s1379_s16 = smov 32  }
 0x2c3   :  { %v257_v40 = vpop.permute.xlu1 %256 }
 0x2c4   :  { %v259_v41 = vadd.f32 %v257_v40, %v240_v39 }
 0x2c6   :  { %v261_v42 = vpack.c.bf16 %v259_v41, %v259_v41 }
 0x2c7   :  { %v215_v43 = vpop.permute.xlu1 %214 }
 0x2c8   :  { %270 = vrot.lane.b32.xlu1 %v261_v42, %s1367_s28 }
 0x2cb   :  { %v218_v44 = vpop.permute.xlu1 %217 }
 0x2cc   :  { %v221_v45 = vsel %vm220_vm1, %v215_v43, %v218_v44 }
 0x2cd   :  { %v223_v46 = vsel %vm222_vm2, %v221_v45, %v215_v43 }
 0x2ce   :  { %v225_v47 = vsel %vm224_vm3, %v223_v46, %v218_v44 }
 0x2cf   :  { %v227_v48 = vsel %vm226_vm4, %v225_v47, %v215_v43 }
 0x2d0   :  { %v229_v49 = vsel %vm228_vm5, %v227_v48, %v218_v44 }
 0x2d1   :  { %v231_v50 = vsel %vm230_vm6, %v229_v49, %v215_v43 }
 0x2d2   :  { %v233_v51 = vsel %vm232_vm7, %v231_v50, %v218_v44 }
 0x2d3   :  { %v234_v52 = vmul.f32 %v1010_v32, %v233_v51 }
 0x2d5   :  { %v235_v55 = vadd.f32 %v234_v52, %v212_v23 }
 0x2d7   :  { %v260_v57 = vpack.c.bf16 %v235_v55, %v235_v55 }
 0x33a   :  { %v271_v53 = vpop.permute.xlu1 %270 }
 0x33b   :  { %v276_v54 = vsel %vm222_vm2, %v271_v53, 0 }
 0x33c   :  { %1068 = vmatpush3.bf16.xpose.msra.mxu1 %v276_v54 }
 0x33d   :  { %1073 = vmatprep.subr.bf16.mxu1 %v1375_v37 }
 0x343   :  { %1070 = vmatmul.mubr.msk.bf16.vlgmr.msra.gmra.mrb[0].mxu1 %vm222_vm2, %v260_v57 }
 0x344   :  { %1074 = vmatpush3.bf16.msra.mxu1 %v335_v58  ;;  %1075 = vmatprep.mubr.msk.bf16.mxu1 %vm1376_vm8, %v1375_v37 }
 0x345   :  { %1079 = vmatprep.subr.bf16.mxu1 %v1375_v37 }
 0x416   :  { %v312_v1 = vpop.f32.mrb[0].mxu1 }
 0x417   :  { %v313_v2 = vadd.f32 %v312_v1, %v1550_v63  ;;  %v1071_v3 = vpop.f32.mrb[1].mxu1 }
 0x418   :  { %v315_v4 = vpop.f32.mrb[2].mxu1 }
 0x419   :  { %v1072_v5 = vpop.f32.mrb[3].mxu1  ;;  %v318_v6 = vsel %vm220_vm1, %v313_v2, -inf }
 0x41a   :  { %319 = vmax.xlane.f32.xlu1 %v318_v6 }
 0x42b   :  { %378 = vrot.lane.b32.xlu1 %v260_v57, %s1378_s7 }
 0x42f   :  { %491 = vrot.lane.b32.xlu1 %v261_v42, %s1379_s16 }
 0x433   :  { %601 = vrot.lane.b32.xlu1 %v261_v42, %s1380_s2 }
 0x4a7   :  { %v320_v7 = vpop.xlane.xlu1 %319 }
 0x4a8   :  { %v321_v8 = vsub.f32 %v313_v2, %v320_v7 }
 0x4aa   :  { %v322_v9 = vmul.f32 1.442695, %v321_v8 }
 0x4ab   :  { %v379_v10 = vpop.permute.xlu1 %378 }
 0x4ac   :  { %1200 = vpow2.f32 %v322_v9 }
 0x4af   :  { %v492_v11 = vpop.permute.xlu1 %491 }
 0x4b0   :  { %v497_v12 = vsel %vm222_vm2, %v492_v11, 0 }
 0x4b1   :  { %1092 = vmatpush3.bf16.xpose.msra.mxu0 %v497_v12 }
 0x4b2   :  { %1103 = vmatprep.subr.bf16.mxu0 %v1375_v37 }
 0x4b3   :  { %v602_v17 = vpop.permute.xlu1 %601 }
 0x4b4   :  { %v607_v19 = vsel %vm222_vm2, %v602_v17, 0 }
 0x4b6   :  { %v1201_v13 = vpop.eup %1200 }
 0x4b7   :  { %v324_v14 = vsel %vm220_vm1, %v1201_v13, 0.0 }
 0x4b8   :  { %325 = vadd.xlane.f32.xlu0 %v324_v14 }
 0x4ce   :  { %380 = vrot.lane.b32.xlu0 %v261_v42, %s1381_s10 }
 0x4d2   :  { %489 = vrot.lane.b32.xlu0 %v260_v57, %s1382_s11 }
 0x4d6   :  { %599 = vrot.lane.b32.xlu0 %v260_v57, %s1383_s12 }
 0x545   :  { %v326_v15 = vpop.xlane.xlu0 %325 }
 0x546   :  { %1202 = vrcp.f32 %v326_v15 }
 0x549   :  { %v381_v16 = vpop.permute.xlu0 %380 }
 0x54a   :  { %v386_v23 = vsel %vm222_vm2, %v381_v16, 0 }
 0x54d   :  { %v490_v18 = vpop.permute.xlu0 %489 }
 0x54e   :  { %1094 = vmatmul.mubr.msk.bf16.vlgmr.msra.gmra.mrb[4].mxu0 %vm222_vm2, %v490_v18  ;;  %v1186_v18 = vld [vmem:[#allocation7] sm:$0xff]  }
 0x54f   :  { %1104 = vmatpush3.bf16.xpose.msra.mxu0 %v607_v19  ;;  %1105 = vmatprep.mubr.msk.bf16.mxu0 %vm1376_vm8, %v1375_v37  ;;  %v1187_v19 = vld [vmem:[#allocation7 + $0x8] sm:$0xff]  }
 0x550   :  { %v1203_v20 = vpop.eup %1202  ;;  %1115 = vmatprep.subr.bf16.mxu0 %v1375_v37 }
 0x551   :  { %v328_v21 = vmul.f32 %v1203_v20, %v1201_v13  ;;  %v600_v24 = vpop.permute.xlu0 %599  ;;  %v1188_v20 = vld [vmem:[#allocation7 + $0x10] sm:$0xff]  }
 0x553   :  { %v329_v22 = vpack.c.bf16 %v328_v21, %v328_v21 }
 0x555   :  { %1076 = vmatmul.mubr.msk.bf16.vlgmr.msra.gmra.mrb[4].mxu1 %vm220_vm1, %v329_v22 }
 0x556   :  { %1080 = vmatpush3.bf16.xpose.msra.mxu1 %v386_v23  ;;  %1106 = vmatmul.mubr.msk.bf16.vlgmr.msra.gmra.mrb[8].mxu0 %vm222_vm2, %v600_v24 }
 0x557   :  { %1081 = vmatprep.mubr.msk.bf16.mxu1 %vm1376_vm8, %v1375_v37  ;;  %1085 = vmatprep.subr.bf16.mxu1 %v1375_v37 }
 0x558   :  { %1123 = vmatprep.mubr.msk.bf16.mxu0 %vm1376_vm8, %v1375_v37  ;;  %1116 = vmatpush3.bf16.msra.mxu0 %v1186_v18 }
 0x559   :  { %1117 = vmatprep.subr.bf16.mxu0 %v1375_v37 }
 0x55c   :  { %1118 = vmatpush3.bf16.msra.mxu0 %v1187_v19 }
 0x55d   :  { %1082 = vmatmul.mubr.msk.bf16.vlgmr.msra.gmra.mrb[8].mxu1 %vm222_vm2, %v379_v10  ;;  %1119 = vmatprep.subr.bf16.mxu0 %v1375_v37 }
 0x55e   :  { %1087 = vmatprep.mubr.msk.bf16.mxu1 %vm1376_vm8, %v1375_v37 }
 0x560   :  { %1120 = vmatpush3.bf16.msra.mxu0 %v1188_v20 }
 0x561   :  { %1121 = vmatprep.subr.bf16.mxu0 %v1375_v37 }
 0x621   :  { %v533_v25 = vpop.f32.mrb[4].mxu0 }
 0x622   :  { %v534_v26 = vadd.f32 %v533_v25, %v1550_v63  ;;  %v1095_v27 = vpop.f32.mrb[5].mxu0  ;;  %v1189_v25 = vld [vmem:[#allocation7 + $0x18] sm:$0xff]  }
 0x623   :  { %v536_v28 = vpop.f32.mrb[6].mxu0  ;;  %1122 = vmatpush3.bf16.msra.mxu0 %v1189_v25 }
 0x624   :  { %v1096_v29 = vpop.f32.mrb[7].mxu0  ;;  %v539_v30 = vsel %vm220_vm1, %v534_v26, -inf  ;;  %1139 = vmatprep.subr.bf16.mxu0 %v1375_v37 }
 0x625   :  { %540 = vmax.xlane.f32.xlu0 %v539_v30 }
 0x628   :  { %v1581_v31 = vpop.f32.mrb[4].mxu1 }
 0x629   :  { %v1077_v32 = vpop.f32.mrb[5].mxu1  ;;  %v643_v33 = vpop.f32.mrb[8].mxu0 }
 0x62a   :  { %v644_v34 = vadd.f32 %v643_v33, %v1550_v63  ;;  %v374_v35 = vpop.f32.mrb[6].mxu1  ;;  %v1107_v36 = vpop.f32.mrb[9].mxu0 }
 0x62b   :  { %v1078_v38 = vpop.f32.mrb[7].mxu1  ;;  %v646_v39 = vpop.f32.mrb[10].mxu0 }
 0x62c   :  { %v1108_v40 = vpop.f32.mrb[11].mxu0  ;;  %v649_v41 = vsel %vm220_vm1, %v644_v34, -inf }
 0x62d   :  { %650 = vmax.xlane.f32.xlu0 %v649_v41 }
 0x630   :  { %v422_v42 = vpop.f32.mrb[8].mxu1 }
 0x631   :  { %v423_v43 = vadd.f32 %v422_v42, %v1550_v63  ;;  %v1083_v44 = vpop.f32.mrb[9].mxu1 }
 0x632   :  { %v425_v45 = vpop.f32.mrb[10].mxu1 }
 0x633   :  { %v1084_v46 = vpop.f32.mrb[11].mxu1  ;;  %v428_v47 = vsel %vm220_vm1, %v423_v43, -inf }
 0x634   :  { %429 = vmax.xlane.f32.xlu1 %v428_v47 }
 0x6b2   :  { %v541_v48 = vpop.xlane.xlu0 %540 }
 0x6b3   :  { %v542_v49 = vsub.f32 %v534_v26, %v541_v48 }
 0x6b5   :  { %v543_v50 = vmul.f32 1.442695, %v542_v49  ;;  %v1190_v49 = vld [vmem:[#allocation8] sm:$0xff]  }
 0x6b7   :  { %1204 = vpow2.f32 %v543_v50  ;;  %v1191_v50 = vld [vmem:[#allocation8 + $0x8] sm:$0xff]  }
 0x6ba   :  { %v651_v51 = vpop.xlane.xlu0 %650 }
 0x6bb   :  { %v652_v52 = vsub.f32 %v644_v34, %v651_v51  ;;  %v1192_v51 = vld [vmem:[#allocation8 + $0x10] sm:$0xff]  }
 0x6bd   :  { %v653_v53 = vmul.f32 1.442695, %v652_v52  ;;  %v1193_v52 = vld [vmem:[#allocation8 + $0x18] sm:$0xff]  }
 0x6bf   :  { %1206 = vpow2.f32 %v653_v53 }
 0x6c1   :  { %v1205_v54 = vpop.eup %1204  ;;  %v430_v55 = vpop.xlane.xlu1 %429 }
 0x6c2   :  { %v431_v57 = vsub.f32 %v423_v43, %v430_v55  ;;  %v545_v58 = vsel %vm220_vm1, %v1205_v54, 0.0 }
 0x6c3   :  { %546 = vadd.xlane.f32.xlu0 %v545_v58 }
 0x6c4   :  { %v432_v59 = vmul.f32 1.442695, %v431_v57  ;;  %v1024_v57 = vld [vmem:[%s1656_s4] ss:$0 sm:$0xff]  ;;  %s1384_s4 = smov [#allocation11]  }
 0x6c5   :  { %s989_s13 = sshll.u32 %s1384_s4, 4  ;;  %s990_s13 = int_to_ptr.vmem [resolvable:$true] %s989_s13 }
 0x6c6   :  { %1208 = vpow2.f32 %v432_v59  ;;  %p1337_p13 = scmp.lt.s32.totalorder %s990_s13, %s990_s13 }
 0x6c9   :  { %v1207_v60 = vpop.eup %1206 }
 0x6ca   :  { %v655_v61 = vsel %vm220_vm1, %v1207_v60, 0.0 }
 0x6cb   :  { %656 = vadd.xlane.f32.xlu1 %v655_v61  ;;  %v1194_v61 = vld [vmem:[#allocation10] sm:$0xff]  }
 0x6d0   :  { %v1209_v62 = vpop.eup %1208 }
 0x6d1   :  { %v434_v63 = vsel %vm220_vm1, %v1209_v62, 0.0 }
 0x6d2   :  { %435 = vadd.xlane.f32.xlu1 %v434_v63  ;;  %v1196_v63 = vld [vmem:[#allocation10 + $0x10] sm:$0xff]  }
 0x6d9   :  { %441 = vrot.lane.b32.xlu0 %v1542_v56, %s1378_s7 }
 0x6e3   :  { %551 = vrot.lane.b32.xlu1 %v1542_v56, %s1382_s11 }
 0x6e7   :  { %661 = vrot.lane.b32.xlu1 %v1542_v56, %s1383_s12 }
 0x750   :  { %v547_v1 = vpop.xlane.xlu0 %546 }
 0x754   :  { %v442_v2 = vpop.permute.xlu0 %441 }
 0x755   :  { %v447_v3 = vsel %vm333_vm9, %v442_v2, 0 }
 0x756   :  { %1086 = vmatpush3.bf16.msra.mxu1 %v447_v3 }
 0x757   :  { %1097 = vmatprep.subr.bf16.mxu1 %v1375_v37 }
 0x758   :  { %v657_v4 = vpop.xlane.xlu1 %656 }
 0x75f   :  { %v436_v5 = vpop.xlane.xlu1 %435 }
 0x760   :  { %1210 = vrcp.f32 %v436_v5 }
 0x761   :  { %1212 = vrcp.f32 %v547_v1  ;;  %v1197_v1 = vld [vmem:[#allocation10 + $0x18] sm:$0xff]  }
 0x762   :  { %1214 = vrcp.f32 %v657_v4 }
 0x763   :  { %v552_v8 = vpop.permute.xlu1 %551 }
 0x764   :  { %v557_v11 = vsel %vm333_vm9, %v552_v8, 0 }
 0x767   :  { %v662_v12 = vpop.permute.xlu1 %661 }
 0x768   :  { %v667_v15 = vsel %vm333_vm9, %v662_v12, 0 }
 0x76a   :  { %v1211_v6 = vpop.eup %1210 }
 0x76b   :  { %v438_v7 = vmul.f32 %v1211_v6, %v1209_v62  ;;  %v1213_v10 = vpop.eup %1212  ;;  %v1195_v62 = vld [vmem:[#allocation10 + $0x8] sm:$0xff]  }
 0x76c   :  { %v549_v56 = vmul.f32 %v1213_v10, %v1205_v54  ;;  %v1215_v14 = vpop.eup %1214 }
 0x76d   :  { %v439_v9 = vpack.c.bf16 %v438_v7, %v438_v7  ;;  %v659_v16 = vmul.f32 %v1215_v14, %v1207_v60 }
 0x76e   :  { %v550_v13 = vpack.c.bf16 %v549_v56, %v549_v56 }
 0x76f   :  { %1088 = vmatmul.mubr.msk.bf16.vlgmr.msra.gmra.mrb[12].mxu1 %vm220_vm1, %v439_v9  ;;  %v660_v17 = vpack.c.bf16 %v659_v16, %v659_v16 }
 0x770   :  { %1098 = vmatpush3.bf16.msra.mxu1 %v557_v11  ;;  %1099 = vmatprep.mubr.msk.bf16.mxu1 %vm1376_vm8, %v1375_v37 }
 0x771   :  { %1109 = vmatprep.subr.bf16.mxu1 %v1375_v37 }
 0x777   :  { %1100 = vmatmul.mubr.msk.bf16.vlgmr.msra.gmra.mrb[16].mxu1 %vm220_vm1, %v550_v13 }
 0x778   :  { %1110 = vmatpush3.bf16.msra.mxu1 %v667_v15  ;;  %1111 = vmatprep.mubr.msk.bf16.mxu1 %vm1376_vm8, %v1375_v37 }
 0x779   :  { %1127 = vmatprep.subr.bf16.mxu1 %v1375_v37 }
 0x77f   :  { %1112 = vmatmul.mubr.msk.bf16.vlgmr.msra.gmra.mrb[20].mxu1 %vm220_vm1, %v660_v17 }
 0x780   :  { %1135 = vmatprep.mubr.msk.bf16.mxu1 %vm1376_vm8, %v1375_v37  ;;  %1128 = vmatpush3.bf16.msra.mxu1 %v1190_v49 }
 0x781   :  { %1129 = vmatprep.subr.bf16.mxu1 %v1375_v37 }
 0x784   :  { %1130 = vmatpush3.bf16.msra.mxu1 %v1191_v50 }
 0x785   :  { %1131 = vmatprep.subr.bf16.mxu1 %v1375_v37 }
 0x788   :  { %1132 = vmatpush3.bf16.msra.mxu1 %v1192_v51 }
 0x789   :  { %1133 = vmatprep.subr.bf16.mxu1 %v1375_v37 }
 0x78c   :  { %1134 = vmatpush3.bf16.msra.mxu1 %v1193_v52 }
 0x842   :  { %v483_v21 = vpop.f32.mrb[12].mxu1 }
 0x843   :  { %710 = vrot.lane.b32.xlu0 %v483_v21, %s1380_s2  ;;  %v1089_v22 = vpop.f32.mrb[13].mxu1 }
 0x844   :  { %v486_v23 = vpop.f32.mrb[14].mxu1 }
 0x845   :  { %v1090_v24 = vpop.f32.mrb[15].mxu1 }
 0x84a   :  { %v593_v26 = vpop.f32.mrb[16].mxu1 }
 0x84b   :  { %714 = vrot.lane.b32.xlu1 %v593_v26, %s1379_s16  ;;  %v1101_v27 = vpop.f32.mrb[17].mxu1 }
 0x84c   :  { %v596_v28 = vpop.f32.mrb[18].mxu1 }
 0x84d   :  { %v1102_v29 = vpop.f32.mrb[19].mxu1 }
 0x852   :  { %v703_v30 = vpop.f32.mrb[20].mxu1 }
 0x853   :  { %718 = vrot.lane.b32.xlu0 %v703_v30, %s1381_s10  ;;  %v1113_v32 = vpop.f32.mrb[21].mxu1 }
 0x854   :  { %v706_v33 = vpop.f32.mrb[22].mxu1 }
 0x855   :  { %v1114_v34 = vpop.f32.mrb[23].mxu1 }
 0x8b5   :  { %v711_v35 = vpop.permute.xlu0 %710 }
 0x8b6   :  { %v721_v38 = vsel %vm222_vm2, %v1581_v31, %v711_v35 }
 0x8bd   :  { %v715_v36 = vpop.permute.xlu1 %714 }
 0x8be   :  { %v722_v39 = vsel %vm226_vm4, %v721_v38, %v715_v36 }
 0x8c5   :  { %v719_v40 = vpop.permute.xlu0 %718 }
 0x8c6   :  { %v723_v41 = vsel %vm230_vm6, %v722_v39, %v719_v40 }
 0x8c7   :  { %v724_v42 = vpack.c.bf16 %v723_v41, %v723_v41 }
 0x8c9   :  { %1124 = vmatmul.mubr.msk.bf16.vlgmr.msra.gmra.mrb[12].mxu0 %vm99_vm0, %v724_v42 }
 0x8ca   :  { %1147 = vmatprep.mubr.msk.bf16.mxu0 %vm1376_vm8, %v1375_v37  ;;  %1140 = vmatpush3.bf16.msra.mxu0 %v1194_v61 }
 0x8cb   :  { %1141 = vmatprep.subr.bf16.mxu0 %v1375_v37 }
 0x8ce   :  { %1142 = vmatpush3.bf16.msra.mxu0 %v1195_v62 }
 0x8cf   :  { %1143 = vmatprep.subr.bf16.mxu0 %v1375_v37 }
 0x8d2   :  { %1144 = vmatpush3.bf16.msra.mxu0 %v1196_v63 }
 0x8d3   :  { %1145 = vmatprep.subr.bf16.mxu0 %v1375_v37 }
 0x8d6   :  { %1146 = vmatpush3.bf16.msra.mxu0 %v1197_v1 }
 0x99c   :  { %v794_v43 = vpop.f32.mrb[12].mxu0 }
 0x99d   :  { %v800_v44 = vadd.f32 %v794_v43, %v1500_v0  ;;  %v1125_v45 = vpop.f32.mrb[13].mxu0 }
 0x99e   :  { %v797_v46 = vpop.f32.mrb[14].mxu0 }
 0x99f   :  { %v1126_v47 = vpop.f32.mrb[15].mxu0  ;;  %v801_v48 = vmul.f32 %v800_v44, %v800_v44 }
 0x9a1   :  { %v802_v31 = vsel %vm99_vm0, %v801_v48, 0.0 }
 0x9a2   :  { %803 = vadd.xlane.f32.xlu1 %v802_v31 }
 0xa2f   :  { %v804_v0 = vpop.xlane.xlu1 %803 }
 0xa30   :  { %v805_v53 = vmul.f32 0.015625, %v804_v0 }
 0xa32   :  { %v806_v54 = vadd.f32 1e-05, %v805_v53 }
 0xa34   :  { %1216 = vrsqrt.f32 %v806_v54 }
 0xa3e   :  { %v1217_v55 = vpop.eup %1216 }
 0xa3f   :  { %v808_v58 = vmul.f32 %v1217_v55, %v800_v44 }
 0xa41   :  { %v816_v59 = vmul.f32 %v1024_v57, %v808_v58 }
 0xa43   :  { %v817_v60 = vpack.c.bf16 %v816_v59, %v816_v59 }
 0xa45   :  { %1136 = vmatmul.mubr.msk.bf16.vlgmr.msra.gmra.mrb[24].mxu1 %vm99_vm0, %v817_v60 }
 0xb18   :  { %v887_v2 = vpop.f32.mrb[24].mxu1 }
 0xb19   :  { %901 = vrot.lane.b32.xlu0 %v887_v2, %s1367_s28  ;;  %v1137_v3 = vpop.f32.mrb[25].mxu1  ;;  %v1030_v6 = vmul.f32 -1.442695, %v887_v2  ;;  %s1332_s28 = scalar_lea.vmem %s990_s13, 128 }
 0xb1a   :  { %v890_v4 = vpop.f32.mrb[26].mxu1  ;;  %p1333_p12 = scmp.ne.s32.totalorder %s990_s13, %s1332_s28  ;;  %p1338_p0 = scmp.lt.s32.totalorder %s1332_s28, %s1332_s28 }
 0xb1b   :  { %v1138_v5 = vpop.f32.mrb[27].mxu1  ;;  %1218 = vpow2.f32 %v1030_v6 }
 0xb1c   :  { %p1339_p1 = por %p1338_p0, %p1337_p13 }
 0xb1e   :  { %p1340_p2 = pnand %p1339_p1, %p1333_p12 }
 0xb25   :  { %v1219_v7 = vpop.eup %1218 }
 0xb26   :  { %v896_v8 = vadd.f32 1.0, %v1219_v7 }
 0xb28   :  { %1220 = vrcp.f32 %v896_v8 }
 0xb32   :  { %v1221_v9 = vpop.eup %1220 }
 0xb33   :  { %v899_v10 = vmul.f32 %v1221_v9, %v887_v2 }
 0xb8b   :  { %v902_v11 = vpop.permute.xlu0 %901 }
 0xb8c   :  { %v904_v56 = vmul.f32 %v902_v11, %v899_v10 }
 0xb8e   :  { %v905_v12 = vpack.c.bf16 %v904_v56, %v904_v56 }
 0xb90   :  { %1148 = vmatmul.mubr.msk.bf16.vlgmr.msra.gmra.mrb[16].mxu0 %vm99_vm0, %v905_v12 }
 0xc63   :  { %v975_v37 = vpop.f32.mrb[16].mxu0 }
 0xc64   :  { %v981_v13 = vadd.f32 %v975_v37, %v800_v44  ;;  %v1149_v14 = vpop.f32.mrb[17].mxu0 }
 0xc65   :  { %v978_v15 = vpop.f32.mrb[18].mxu0 }
 0xc66   :  { %982 = vst.msk [vmem:[#allocation11] sm:$0xff] %vm99_vm0, %v981_v13  ;;  %v1150_v16 = vpop.f32.mrb[19].mxu0 }
 0xc67   :  { %1343 = shalt.err (!%p1340_p2)
}
 0xc68   :  { %s1344_s17 = scalar_lea.hbm %s1660_s8, 128 }
 0xc69   :  { %p1345_p3 = scmp.ne.s32.totalorder %s1660_s8, %s1344_s17  ;;  %p1348_p4 = scmp.lt.u32.totalorder %s1344_s17, %s1660_s8 }
 0xc6b   :  { %p1350_p5 = pnand %p1348_p4, %p1345_p3 }
 0xc6d   :  { %1353 = shalt.err (!%p1350_p5)
}
 0xc6e   :  { %992 = dma.vmem_to_hbm [thread:$0]  %s990_s13, 128, %s1660_s8, [#allocation4]  }
 0xc6f   :  { %1360 = dma.done.wait [#allocation4], 128  }
 0xc70   :  { %1361 = vsyncadd [#allocation4], 4294967168 }
 0xc71   :  { %996 = vsyncpa [#allocation3], 1 }
 0xc72   :  { %997 = vsyncpa [#allocation6], 1 }
 0xc73   :  { %998 = vsyncpa [#allocation9], 1 }
 0xc74   :  { %999 = vsyncpa [#allocation4], 1 }

</bundles_post_ra>
